<compile_context>
chip_gen: v5e
topology: v5e:2x2
jax: 0.10.0
libtpu: 0.0.40
codegen_flags: <defaults>
</compile_context>

<pallas_src>
import jax
import jax.numpy as jnp
from jax.experimental import pallas as pl
from jax.experimental.pallas import tpu as pltpu


def _round_up(x, m):
    return (x + m - 1) // m * m


def _default_l1_bf16():
    """bf16 layer-1 epilogue on chips with a bf16 VPU (v6e/v7x), f32 on v5e."""
    try:
        kind = jax.devices()[0].device_kind.lower()
    except Exception:
        return True
    return "v5" not in kind


def _make_kernel(l1_bf16):
    def kernel(xt_ref, w1_ref, b1_ref, w2_ref, b2_ref, w3_ref, b3_ref, out_ref):
        # Layer 1: (H, S) @ (S, TB) -> (H, TB); bf16 MXU inputs, f32 accumulate.
        h1 = jnp.dot(w1_ref[...], xt_ref[...],
                     preferred_element_type=jnp.float32)
        if l1_bf16:
            # bf16 VPU epilogue (v6e/v7x): halves VALU ops + h1 vreg footprint.
            h1 = jnp.maximum(h1.astype(jnp.bfloat16) + b1_ref[...], 0.0)
        else:
            # v5e: no bf16 VPU -> stay f32, round once for the L2 matmul.
            h1 = jnp.maximum(h1 + b1_ref[...], 0.0).astype(jnp.bfloat16)
        # Layer 2: (H, H) @ (H, TB) -> (H, TB); f32 epilogue (feeds f32 reduce).
        h2 = jnp.dot(w2_ref[...], h1, preferred_element_type=jnp.float32)
        h2 = jnp.maximum(h2 + b2_ref[...], 0.0)
        # Layer 3 (out_features == 1): VPU multiply + sublane reduce; avoids an
        # M=1 MXU matmul.  b3 is a scalar read from SMEM.
        v = jnp.sum(h2 * w3_ref[...], axis=0, keepdims=True) + b3_ref[0, 0]
        out_ref[...] = v.astype(out_ref.dtype)                # lane-dense (1, TB)
    return kernel


def _choose_tiling(B, batch_tile):
    """Balanced batch tiles (multiple of 128) with >=2 (preferably even)
    grid steps when B > 128 so v7x can use both TensorCores."""
    bt = max(128, _round_up(batch_tile, 128))
    nt = pl.cdiv(B, bt)
    if B > 128 and nt < 2:
        nt = 2
    if nt > 1 and nt % 2 == 1:
        nt += 1
    TB = _round_up(pl.cdiv(B, nt), 128)
    B_pad = _round_up(B, TB)
    return TB, B_pad


def value_critic_forward_transposed(state_t, params, *, batch_tile=4096,
                                    l1_bf16=None):
    """state_t: (state_dim, B) — batch on the trailing (lane) axis, ideally
    already bf16 (avoids any wrapper-side layout/cast pass).
    Returns V(s): (B, 1) float32.

    params: (w1, b1, w2, b2, w3, b3) with
      w1: (H, S)  b1: (H, 1)  w2: (H, H)  b2: (H, 1)  w3: (H, 1)  b3: (1, 1)
    (weights stored PyTorch-style as (out_features, in_features)).
    """
    w1, b1, w2, b2, w3, b3 = params
    S, B = state_t.shape
    H = w1.shape[0]
    if l1_bf16 is None:
        l1_bf16 = _default_l1_bf16()

    TB, B_pad = _choose_tiling(B, batch_tile)

    xt = state_t.astype(jnp.bfloat16)                         # no-op if already bf16
    if B_pad != B:
        xt = jnp.pad(xt, ((0, 0), (0, B_pad - B)))            # zero-pad dead lanes

    b1_k = b1.astype(jnp.bfloat16) if l1_bf16 else b1.astype(jnp.float32)

    resident = dict(pipeline_mode=pl.Buffered(1))             # constant across grid
    grid = (B_pad // TB,)
    out = pl.pallas_call(
        _make_kernel(l1_bf16),
        out_shape=jax.ShapeDtypeStruct((1, B_pad), jnp.float32),
        grid=grid,
        in_specs=[
            pl.BlockSpec((S, TB), lambda i: (0, i)),          # state (tiled on batch)
            pl.BlockSpec((H, S), lambda i: (0, 0), **resident),   # W1 (VMEM-resident)
            pl.BlockSpec((H, 1), lambda i: (0, 0), **resident),   # b1
            pl.BlockSpec((H, H), lambda i: (0, 0), **resident),   # W2
            pl.BlockSpec((H, 1), lambda i: (0, 0), **resident),   # b2
            pl.BlockSpec((H, 1), lambda i: (0, 0), **resident),   # w3 (f32, VPU)
            pl.BlockSpec(memory_space=pltpu.MemorySpace.SMEM),     # b3 scalar
        ],
        out_specs=pl.BlockSpec((1, TB), lambda i: (0, i)),
        compiler_params=pltpu.CompilerParams(
            dimension_semantics=("parallel",)),
    )(xt, w1.astype(jnp.bfloat16), b1_k, w2.astype(jnp.bfloat16),
      b2.astype(jnp.float32), w3.astype(jnp.float32), b3.astype(jnp.float32))

    return out[0, :B].reshape(B, 1)


def value_critic_forward(state, params, *, batch_tile=4096, l1_bf16=None):
    """Convenience wrapper taking PyTorch-layout state: (B, state_dim).

    For hot PPO loops, keep states in (state_dim, B) bf16 upstream and call
    `value_critic_forward_transposed` directly to skip this transpose pass.
    """
    return value_critic_forward_transposed(state.T, params,
                                           batch_tile=batch_tile,
                                           l1_bf16=l1_bf16)


def init_params(key, state_dim, hidden_dim=64, dtype=jnp.float32):
    """Deterministic init mimicking PyTorch's default Linear init
    (uniform in +-1/sqrt(fan_in)). Weights stored as (out, in),
    biases as (out, 1), b3 as (1, 1)."""
    def linear(key, fan_in, fan_out):
        kw, kb = jax.random.split(key)
        bound = 1.0 / jnp.sqrt(fan_in)
        w = jax.random.uniform(kw, (fan_out, fan_in), dtype, -bound, bound)
        b = jax.random.uniform(kb, (fan_out, 1), dtype, -bound, bound)
        return w, b

    k1, k2, k3 = jax.random.split(key, 3)
    w1, b1 = linear(k1, state_dim, hidden_dim)
    w2, b2 = linear(k2, hidden_dim, hidden_dim)
    w3, b3 = linear(k3, hidden_dim, 1)          # w3: (1, H), b3: (1, 1)
    return (w1, b1, w2, b2, w3.T, b3)           # w3 stored as (H, 1)


def _reference_forward(state, params):
    """Pure-JAX f32 reference matching the PyTorch module."""
    w1, b1, w2, b2, w3, b3 = params
    h = jnp.maximum(state @ w1.T + b1.T, 0.0)
    h = jnp.maximum(h @ w2.T + b2.T, 0.0)
    return h @ w3 + b3                           # (B, 1)


if __name__ == "__main__":
    key = jax.random.PRNGKey(0)
    k_params, k_state = jax.random.split(key)

    batch = 8
    state_dim = 16
    hidden_dim = 32

    params = init_params(k_params, state_dim, hidden_dim)
    state = jax.random.normal(k_state, (batch, state_dim), dtype=jnp.float32)

    # (B, S) convenience path (one producer-side transpose).
    value = value_critic_forward(state, params)
    value = jax.block_until_ready(value)

    # Pre-transposed (S, B) bf16 path — what a hot PPO loop should feed.
    value_t = value_critic_forward_transposed(
        state.T.astype(jnp.bfloat16), params)
    value_t = jax.block_until_ready(value_t)

    ref = _reference_forward(state, params)
    assert value.shape == (batch, 1), value.shape
    assert value_t.shape == (batch, 1), value_t.shape
    # bf16 MXU inputs (f32 accumulate) -> relaxed tolerance vs the f32 reference.
    max_err = float(jnp.max(jnp.abs(value - ref)))
    assert jnp.allclose(value, ref, atol=5e-2, rtol=5e-2), (
        f"mismatch vs reference, max abs err {max_err}")
    max_err_t = float(jnp.max(jnp.abs(value_t - ref)))
    assert jnp.allclose(value_t, ref, atol=5e-2, rtol=5e-2), (
        f"transposed-path mismatch vs reference, max abs err {max_err_t}")

    print("KERNEL_OK")
</pallas_src>

<mosaic_0001>
module attributes {stable_mosaic.version = 11 : i64} {
  func.func @kernel(%arg0: i32, %arg1: memref<16x128xbf16, #tpu.memory_space<vmem>>, %arg2: memref<32x16xbf16, #tpu.memory_space<vmem>>, %arg3: memref<32x1xbf16, #tpu.memory_space<vmem>>, %arg4: memref<32x32xbf16, #tpu.memory_space<vmem>>, %arg5: memref<32x1xf32, #tpu.memory_space<vmem>>, %arg6: memref<32x1xf32, #tpu.memory_space<vmem>>, %arg7: memref<1x1xf32, #tpu.memory_space<smem>>, %arg8: memref<1x128xf32, #tpu.memory_space<vmem>>) attributes {dimension_semantics = [#tpu.dimension_semantics<parallel>], iteration_bounds = array<i64: 1>, scalar_prefetch = 0 : i64, scratch_operands = 0 : i64, tpu.core_type = #tpu.core_type<tc>, window_params = [{transform_indices = @transform_0, window_bounds = array<i64: 16, 128>}, {pipeline_mode = #tpu.pipeline_mode<synchronous>, transform_indices = @transform_1, window_bounds = array<i64: 32, 16>}, {pipeline_mode = #tpu.pipeline_mode<synchronous>, transform_indices = @transform_2, window_bounds = array<i64: 32, 1>}, {pipeline_mode = #tpu.pipeline_mode<synchronous>, transform_indices = @transform_3, window_bounds = array<i64: 32, 32>}, {pipeline_mode = #tpu.pipeline_mode<synchronous>, transform_indices = @transform_4, window_bounds = array<i64: 32, 1>}, {pipeline_mode = #tpu.pipeline_mode<synchronous>, transform_indices = @transform_5, window_bounds = array<i64: 32, 1>}, {transform_indices = @transform_6, window_bounds = array<i64: 1, 1>}, {transform_indices = @transform_7, window_bounds = array<i64: 1, 128>}]} {
    %c0 = arith.constant 0 : index
    %c0_0 = arith.constant 0 : index
    %0 = vector.load %arg2[%c0, %c0_0] : memref<32x16xbf16, #tpu.memory_space<vmem>>, vector<32x16xbf16>
    %c0_1 = arith.constant 0 : index
    %c0_2 = arith.constant 0 : index
    %1 = vector.load %arg1[%c0_1, %c0_2] : memref<16x128xbf16, #tpu.memory_space<vmem>>, vector<16x128xbf16>
    %cst = arith.constant dense<0.000000e+00> : vector<32x128xf32>
    %2 = tpu.matmul %0, %1, %cst {dimension_numbers = #tpu.dot_dimension_numbers<[1], [0], [0], [1], [0, 0, 1, 1], [], []>} : vector<32x16xbf16>, vector<16x128xbf16>, vector<32x128xf32> -> vector<32x128xf32>
    %3 = arith.truncf %2 : vector<32x128xf32> to vector<32x128xbf16>
    %c0_3 = arith.constant 0 : index
    %c0_4 = arith.constant 0 : index
    %4 = vector.load %arg3[%c0_3, %c0_4] : memref<32x1xbf16, #tpu.memory_space<vmem>>, vector<32x1xbf16>
    %5 = vector.broadcast %4 : vector<32x1xbf16> to vector<32x128xbf16>
    %6 = arith.addf %3, %5 : vector<32x128xbf16>
    %cst_5 = arith.constant 0.000000e+00 : bf16
    %7 = vector.broadcast %cst_5 : bf16 to vector<32x128xbf16>
    %8 = arith.maximumf %6, %7 : vector<32x128xbf16>
    %c0_6 = arith.constant 0 : index
    %c0_7 = arith.constant 0 : index
    %9 = vector.load %arg4[%c0_6, %c0_7] : memref<32x32xbf16, #tpu.memory_space<vmem>>, vector<32x32xbf16>
    %cst_8 = arith.constant dense<0.000000e+00> : vector<32x128xf32>
    %10 = tpu.matmul %9, %8, %cst_8 {dimension_numbers = #tpu.dot_dimension_numbers<[1], [0], [0], [1], [0, 0, 1, 1], [], []>} : vector<32x32xbf16>, vector<32x128xbf16>, vector<32x128xf32> -> vector<32x128xf32>
    %c0_9 = arith.constant 0 : index
    %c0_10 = arith.constant 0 : index
    %11 = vector.load %arg5[%c0_9, %c0_10] : memref<32x1xf32, #tpu.memory_space<vmem>>, vector<32x1xf32>
    %12 = vector.broadcast %11 : vector<32x1xf32> to vector<32x128xf32>
    %13 = arith.addf %10, %12 : vector<32x128xf32>
    %cst_11 = arith.constant 0.000000e+00 : f32
    %14 = vector.broadcast %cst_11 : f32 to vector<32x128xf32>
    %15 = arith.maximumf %13, %14 : vector<32x128xf32>
    %c0_12 = arith.constant 0 : index
    %c0_13 = arith.constant 0 : index
    %16 = vector.load %arg6[%c0_12, %c0_13] : memref<32x1xf32, #tpu.memory_space<vmem>>, vector<32x1xf32>
    %17 = vector.broadcast %16 : vector<32x1xf32> to vector<32x128xf32>
    %18 = arith.mulf %15, %17 : vector<32x128xf32>
    %cst_14 = arith.constant dense<0.000000e+00> : vector<128xf32>
    %19 = vector.multi_reduction <add>, %18, %cst_14 [0] : vector<32x128xf32> to vector<128xf32>
    %20 = vector.shape_cast %19 : vector<128xf32> to vector<1x128xf32>
    %c0_15 = arith.constant 0 : index
    %c0_16 = arith.constant 0 : index
    %21 = memref.load %arg7[%c0_15, %c0_16] : memref<1x1xf32, #tpu.memory_space<smem>>
    %22 = vector.broadcast %21 : f32 to vector<1x128xf32>
    %23 = arith.addf %20, %22 : vector<1x128xf32>
    %c0_17 = arith.constant 0 : index
    %c0_18 = arith.constant 0 : index
    %24 = vector.load %arg8[%c0_17, %c0_18] : memref<1x128xf32, #tpu.memory_space<vmem>>, vector<1x128xf32>
    tpu.vector_store %arg8[%c0_17, %c0_18], %23 {strides = array<i32>} : memref<1x128xf32, #tpu.memory_space<vmem>>, vector<1x128xf32>,
    return
  }
  func.func @transform_0(%arg0: i32) -> (i32, i32) {
    %c0_i32 = arith.constant 0 : i32
    %c0_i32_0 = arith.constant 0 : i32
    return %c0_i32, %arg0 : i32, i32
  }
  func.func @transform_1(%arg0: i32) -> (i32, i32) {
    %c0_i32 = arith.constant 0 : i32
    %c0_i32_0 = arith.constant 0 : i32
    %c0_i32_1 = arith.constant 0 : i32
    return %c0_i32, %c0_i32_0 : i32, i32
  }
  func.func @transform_2(%arg0: i32) -> (i32, i32) {
    %c0_i32 = arith.constant 0 : i32
    %c0_i32_0 = arith.constant 0 : i32
    %c0_i32_1 = arith.constant 0 : i32
    return %c0_i32, %c0_i32_0 : i32, i32
  }
  func.func @transform_3(%arg0: i32) -> (i32, i32) {
    %c0_i32 = arith.constant 0 : i32
    %c0_i32_0 = arith.constant 0 : i32
    %c0_i32_1 = arith.constant 0 : i32
    return %c0_i32, %c0_i32_0 : i32, i32
  }
  func.func @transform_4(%arg0: i32) -> (i32, i32) {
    %c0_i32 = arith.constant 0 : i32
    %c0_i32_0 = arith.constant 0 : i32
    %c0_i32_1 = arith.constant 0 : i32
    return %c0_i32, %c0_i32_0 : i32, i32
  }
  func.func @transform_5(%arg0: i32) -> (i32, i32) {
    %c0_i32 = arith.constant 0 : i32
    %c0_i32_0 = arith.constant 0 : i32
    %c0_i32_1 = arith.constant 0 : i32
    return %c0_i32, %c0_i32_0 : i32, i32
  }
  func.func @transform_6(%arg0: i32) -> (i32, i32) {
    %c0_i32 = arith.constant 0 : i32
    %c0_i32_0 = arith.constant 0 : i32
    %c0_i32_1 = arith.constant 0 : i32
    return %c0_i32, %c0_i32_0 : i32, i32
  }
  func.func @transform_7(%arg0: i32) -> (i32, i32) {
    %c0_i32 = arith.constant 0 : i32
    %c0_i32_0 = arith.constant 0 : i32
    return %c0_i32, %arg0 : i32, i32
  }
}

</mosaic_0001>

<bundles_post_ra>
// kernel: tpu_custom_call.1
= control target key start
LH: loop header
LB: loop body
LE: loop exit
PB: predicated region body
PF: predicated region fallthrough
CT: control target
= control target key end

     0   :  { %v336_v3 = vmov 0   ;;  %vm51_vm0 = vcmask 130048   ;;  %s436_s0 = inlined_call_operand.vmem [shape: bf16[16,128], index: 0, kind: input, shape index: {}]   ;;  %s437_s1 = inlined_call_operand.vmem [shape: bf16[32,16], index: 1, kind: input, shape index: {}]   ;;  %s438_s2 = inlined_call_operand.vmem [shape: bf16[32,1], index: 2, kind: input, shape index: {}]   ;;  %s439_s3 = inlined_call_operand.vmem [shape: bf16[32,32], index: 3, kind: input, shape index: {}]   ;;  %s440_s4 = inlined_call_operand.vmem [shape: f32[32,1], index: 4, kind: input, shape index: {}]   ;;  %s441_s5 = inlined_call_operand.vmem [shape: f32[32,1], index: 5, kind: input, shape index: {}]   ;;  %s442_s6 = inlined_call_operand.<no memory space> [shape: f32[1,1], index: 6, kind: input, shape index: {}]   ;;  %s443_s7 = inlined_call_operand.hbm [shape: f32[1,128], index: 7, kind: output, shape index: {}]  }
   0x1   :  { %v83_v0 = vld [vmem:[%s438_s2 + $0x8] sm:$0xf]  ;;  %v81_v1 = vld [vmem:[%s438_s2] sm:$0xf]  ;;  %307 = vset.pattern.permute.xlu0 %v336_v3  ;;  %308 = vset.pattern.permute.xlu1 %v336_v3 }
   0x2   :  { %v298_v2 = vld [vmem:[%s436_s0] sm:$0xff]  ;;  %105 = vperm.xlu0 %307, %v83_v0   ;;  %87 = vperm.xlu1 %308, %v81_v1   ;;  %v297_v4 = vld [vmem:[%s437_s1 + $0x8] sm:$0xff] }
   0x3   :  { %v296_v5 = vld [vmem:[%s437_s1] sm:$0xff]  ;;  %301 = vmatpush.bf16.msra.mxu3 %v298_v2  ;;  %65 = vmatpush.bf16.msra.mxu0 %v298_v2 }
   0x4   :  { %13 = vsyncpa [#allocation4], 0  ;;  %309 = vset.pattern.permute.xlu2 %v336_v3  ;;  %v84_v6 = vld [vmem:[%s438_s2 + $0xc] sm:$0xf]  ;;  %v82_v7 = vld [vmem:[%s438_s2 + $0x4] sm:$0xf] }
   0x5   :  { %v153_v8 = vld [vmem:[%s440_s4 + $0x10] sm:$0xff]  ;;  %v154_v9 = vld [vmem:[%s440_s4 + $0x18] sm:$0xff]  ;;  %v216_v10 = vld [vmem:[%s441_s5 + $0x8] sm:$0xff]  ;;  %v337_v15 = vmov 839922192   ;;  %vm185_vm1 = vcmask 261120  }
   0x6   :  { %285 = vmatmul.msk.bf16.vlgmr.msra.gmra.mxu3 %vm51_vm0, %v297_v4  ;;  %284 = vmatmul.msk.bf16.vlgmr.msra.gmra.mxu0 %vm51_vm0, %v296_v5  ;;  %v217_v11 = vld [vmem:[%s441_s5 + $0x10] sm:$0xff]  ;;  %v151_v14 = vld [vmem:[%s440_s4] sm:$0xff]  ;;  %v91_v16 = vunpack.c.l.s4 %v337_v15  ;;  %v152_v20 = vld [vmem:[%s440_s4 + $0x8] sm:$0xff]  ;;  %s338_s8 = smov [#allocation3]   ;;  %s263_s11 = sshll.u32 %s443_s7, 4  ;;  %s264_s11 = int_to_ptr.hbm [resolvable:$true] %s263_s11 }
   0x7   :  { %157 = vperm.xlu2 %309, %v151_v14   ;;  %v215_v35 = vld [vmem:[%s441_s5] sm:$0xff]  ;;  %v218_v51 = vld [vmem:[%s441_s5 + $0x18] sm:$0xff]  ;;  %v300_v54 = vld [vmem:[%s439_s3 + $0x8] sm:$0xff]  ;;  %s261_s9 = sshll.u32 %s338_s8, 4  ;;  %s262_s9 = int_to_ptr.vmem [resolvable:$true] %s261_s9 }
   0x8   :  { %v92_v18 = vunpack.c.0.s8 %v91_v16  ;;  %v299_v53 = vld [vmem:[%s439_s3] sm:$0xff] }
   0xa   :  { %114 = vperm.xlu0 %307, %v84_v6   ;;  %96 = vperm.xlu1 %308, %v82_v7  }
   0xf   :  { %162 = vperm.xlu2 %309, %v152_v20  }
  0x12   :  { %167 = vperm.xlu0 %307, %v153_v8   ;;  %172 = vperm.xlu1 %308, %v154_v9  }
  0x17   :  { %221 = vperm.xlu2 %309, %v215_v35  }
  0x1a   :  { %226 = vperm.xlu0 %307, %v216_v10   ;;  %231 = vperm.xlu1 %308, %v217_v11  }
  0x1f   :  { %236 = vperm.xlu2 %309, %v218_v51  }
  0x61   :  { %v158_v55 = vpop.permute.xlu2 %157 }
  0x69   :  { %v163_v56 = vpop.permute.xlu2 %162 }
  0x71   :  { %v222_v62 = vpop.permute.xlu2 %221 }
  0x74   :  { %v88_v12 = vpop.permute.xlu1 %87  ;;  %v106_v17 = vpop.permute.xlu0 %105 }
  0x75   :  { %v111_v22 = vperm.slane %v106_v17, %v92_v18  ;;  %v93_v24 = vperm.slane %v88_v12, %v92_v18 }
  0x77   :  { %v127_v30 = vunpack.c.l.bf16 %v111_v22  ;;  %v125_v33 = vunpack.c.l.bf16 %v93_v24 }
  0x79   :  { %v237_v14 = vpop.permute.xlu2 %236 }
  0x7c   :  { %v97_v25 = vpop.permute.xlu1 %96  ;;  %v115_v29 = vpop.permute.xlu0 %114 }
  0x7d   :  { %v102_v26 = vperm.slane %v97_v25, %v92_v18  ;;  %v120_v31 = vperm.slane %v115_v29, %v92_v18 }
  0x7f   :  { %v126_v36 = vunpack.c.l.bf16 %v102_v26  ;;  %v128_v40 = vunpack.c.l.bf16 %v120_v31 }
  0x83   :  { %v67_v13 = vpop.f32.mrf.mxu0 }
  0x84   :  { %v77_v27 = vpack.c.bf16 %v67_v13, %v67_v13  ;;  %v168_v58 = vpop.permute.xlu0 %167  ;;  %v173_v60 = vpop.permute.xlu1 %172 }
  0x86   :  { %v121_v37 = vunpack.c.l.bf16 %v77_v27 }
  0x88   :  { %v129_v43 = vadd.f32 %v125_v33, %v121_v37 }
  0x89   :  { %v72_v19 = vpop.f32.mrf.mxu3 }
  0x8a   :  { %v79_v23 = vpack.c.bf16 %v72_v19, %v72_v19  ;;  %v141_v50 = vmax.f32 %v129_v43, 0.0 }
  0x8b   :  { %v69_v21 = vpop.f32.mrf.mxu0 }
  0x8c   :  { %v78_v28 = vpack.c.bf16 %v69_v21, %v69_v21  ;;  %v123_v32 = vunpack.c.l.bf16 %v79_v23  ;;  %v227_v4 = vpop.permute.xlu0 %226  ;;  %v232_v11 = vpop.permute.xlu1 %231  ;;  %v253_v23 = vstv %s442_s6 }
  0x8e   :  { %v122_v38 = vunpack.c.l.bf16 %v78_v28  ;;  %v131_v41 = vadd.f32 %v127_v30, %v123_v32 }
  0x90   :  { %v130_v44 = vadd.f32 %v126_v36, %v122_v38  ;;  %v143_v47 = vmax.f32 %v131_v41, 0.0 }
  0x91   :  { %v74_v34 = vpop.f32.mrf.mxu3 }
  0x92   :  { %v80_v39 = vpack.c.bf16 %v74_v34, %v74_v34  ;;  %v142_v48 = vmax.f32 %v130_v44, 0.0 }
  0x94   :  { %v124_v42 = vunpack.c.l.bf16 %v80_v39  ;;  %v145_v52 = vpack.c.bf16 %v142_v48, %v141_v50 }
  0x96   :  { %v132_v45 = vadd.f32 %v128_v40, %v124_v42 }
  0x98   :  { %v144_v46 = vmax.f32 %v132_v45, 0.0 }
  0x9a   :  { %v146_v49 = vpack.c.bf16 %v144_v46, %v143_v47 }
  0x9c   :  { %198 = vmatpush.bf16.msra.mxu1 %v146_v49  ;;  %302 = vmatpush.bf16.msra.mxu2 %v146_v49 }
  0xa0   :  { %199 = vmatpush.bf16.msra.mxu1 %v145_v52  ;;  %303 = vmatpush.bf16.msra.mxu2 %v145_v52 }
  0xa3   :  { %294 = vmatmul.msk.bf16.vlgmr.msra.gmra.mxu1 %vm185_vm1, %v299_v53  ;;  %295 = vmatmul.msk.bf16.vlgmr.msra.gmra.mxu2 %vm185_vm1, %v300_v54 }
 0x120   :  { %v201_v57 = vpop.f32.mrf.mxu1 }
 0x121   :  { %v202_v59 = vadd.f32 %v201_v57, %v158_v55 }
 0x123   :  { %v211_v0 = vmax.f32 %v202_v59, 0.0 }
 0x125   :  { %v239_v5 = vmul.f32 %v222_v62, %v211_v0 }
 0x126   :  { %v206_v61 = vpop.f32.mrf.mxu2 }
 0x127   :  { %v207_v1 = vadd.f32 %v206_v61, %v168_v58 }
 0x128   :  { %v203_v63 = vpop.f32.mrf.mxu1 }
 0x129   :  { %v204_v2 = vadd.f32 %v203_v63, %v163_v56  ;;  %v213_v6 = vmax.f32 %v207_v1, 0.0 }
 0x12b   :  { %v212_v3 = vmax.f32 %v204_v2, 0.0  ;;  %v241_v12 = vmul.f32 %v232_v11, %v213_v6 }
 0x12d   :  { %v240_v7 = vmul.f32 %v227_v4, %v212_v3 }
 0x12e   :  { %v208_v8 = vpop.f32.mrf.mxu2 }
 0x12f   :  { %v243_v9 = vadd.f32 %v240_v7, %v239_v5  ;;  %v209_v10 = vadd.f32 %v208_v8, %v173_v60 }
 0x131   :  { %v214_v13 = vmax.f32 %v209_v10, 0.0  ;;  %v244_v16 = vadd.f32 %v243_v9, %v241_v12 }
 0x133   :  { %v242_v15 = vmul.f32 %v237_v14, %v214_v13 }
 0x135   :  { %v245_v17 = vadd.f32 %v244_v16, %v242_v15 }
 0x137   :  { %v246_v18 = vrot.slane %v245_v17, 4 }
 0x139   :  { %v247_v19 = vadd.f32 %v246_v18, %v245_v17 }
 0x13b   :  { %v248_v20 = vrot.slane %v247_v19, 2 }
 0x13d   :  { %v249_v21 = vadd.f32 %v248_v20, %v247_v19 }
 0x13f   :  { %v250_v22 = vrot.slane %v249_v21, 1 }
 0x141   :  { %v251_v24 = vadd.f32 %v250_v22, %v249_v21 }
 0x143   :  { %v254_v25 = vadd.f32 %v253_v23, %v251_v24 }
 0x145   :  { %255 = vst [vmem:[#allocation3] sm:$0x1] %v254_v25 }
 0x146   :  { %266 = dma.vmem_to_hbm [thread:$0]  %s262_s9, 16, %s264_s11, [#allocation4]  }
 0x147   :  { %334 = dma.done.wait [#allocation4], 16  }
 0x148   :  { %335 = vsyncadd [#allocation4], 4294967280 }
 0x149   :  { %271 = vsyncpa [#allocation4], 1 }

</bundles_post_ra>
